<compile_context>
chip_gen: v7x
topology: tpu7x:2x2x1
jax: 0.10.0
libtpu: 0.0.40
codegen_flags: <defaults>
</compile_context>

<pallas_src>
import functools

import jax
import jax.numpy as jnp
from jax.experimental import pallas as pl
from jax.experimental.pallas import tpu as pltpu


# ---------------------------------------------------------------------------
# Fused channel-attention kernel.  Per grid step:
#   x_ref, o_ref : (Nb, C, H*W)   NCHW images, lane-dense last axis
#   w1_ref       : (Cr, C)        b1_ref: (Cr, 1)
#   w2_ref       : (C, Cr)        b2_ref: (C, 1)
# ---------------------------------------------------------------------------
def _ca_kernel(x_ref, w1_ref, b1_ref, w2_ref, b2_ref, o_ref, *, inv_hw):
    nb = x_ref.shape[0]
    w1 = w1_ref[...]                                     # (Cr, C)  f32
    b1 = b1_ref[...]                                     # (Cr, 1)
    w2 = w2_ref[...]                                     # (C, Cr)
    b2 = b2_ref[...]                                     # (C, 1)

    for n in range(nb):                                  # static, Nb is small
        x = x_ref[n]                                     # (C, HW), input dtype
        xf = x.astype(jnp.float32)

        # ---- pool + FC1 fused: one MXU matmul, then a tiny lane reduce ----
        t = jnp.dot(w1, xf, preferred_element_type=jnp.float32)      # (Cr, HW)
        y = jnp.sum(t, axis=-1, keepdims=True) * inv_hw + b1         # (Cr, 1)
        y = jnp.maximum(y, 0.0)                                       # ReLU

        # ---- FC2 + sigmoid ----
        y = jnp.dot(w2, y, preferred_element_type=jnp.float32) + b2   # (C, 1)
        y = jax.nn.sigmoid(y)                                          # (C, 1)

        # ---- channel scale: (C,1) broadcasts across the HW lanes ----
        o_ref[n] = x * y.astype(x.dtype)


def _choose_block_n(n, image_bytes, target_bytes=512 * 1024):
    """Largest divisor Nb of n with Nb*image_bytes <= target, keeping >= 2 grid
    steps when n >= 2 (so the batch axis can feed both v7x TensorCores)."""
    best = 1
    for nb in range(1, n + 1):
        if n % nb != 0:
            continue
        if nb * image_bytes > target_bytes:
            break
        if n >= 2 and n // nb < 2:
            break
        best = nb
    return best


def ca_layer(x_nchw, params):
    """CALayer forward. x_nchw: (N, C, H, W) -> (N, C, H, W)."""
    N, C, H, W = x_nchw.shape
    HW = H * W
    Cr = params["w1"].shape[0]
    itemsize = jnp.dtype(x_nchw.dtype).itemsize

    x2 = x_nchw.reshape(N, C, HW)                        # free reshape, no transpose
    Nb = _choose_block_n(N, C * HW * itemsize)
    grid = (N // Nb,)

    cost = pl.CostEstimate(
        flops=int(N * (2 * Cr * C * HW + Cr * HW + 2 * C * Cr + C * HW)),
        transcendentals=int(N * C),                      # sigmoid
        bytes_accessed=int(2 * N * C * HW * itemsize
                           + (Cr * C + Cr + C * Cr + C) * 4),
    )

    out = pl.pallas_call(
        functools.partial(_ca_kernel, inv_hw=1.0 / HW),
        out_shape=jax.ShapeDtypeStruct((N, C, HW), x2.dtype),
        grid=grid,
        in_specs=[
            pl.BlockSpec((Nb, C, HW), lambda n: (n, 0, 0)),
            pl.BlockSpec((Cr, C), lambda n: (0, 0)),
            pl.BlockSpec((Cr, 1), lambda n: (0, 0)),
            pl.BlockSpec((C, Cr), lambda n: (0, 0)),
            pl.BlockSpec((C, 1), lambda n: (0, 0)),
        ],
        out_specs=pl.BlockSpec((Nb, C, HW), lambda n: (n, 0, 0)),
        compiler_params=pltpu.CompilerParams(dimension_semantics=("parallel",)),
        cost_estimate=cost,
    )(x2, params["w1"], params["b1"], params["w2"], params["b2"])

    return out.reshape(N, C, H, W)


def init_params(key, channels, reduction):
    """Weights in the PyTorch Conv2d(1x1) layout: w1 (Cr, C), w2 (C, Cr)."""
    cr = channels // reduction
    ks = jax.random.split(key, 4)
    s = 0.1
    return {
        "w1": s * jax.random.normal(ks[0], (cr, channels), jnp.float32),
        "b1": s * jax.random.normal(ks[1], (cr, 1), jnp.float32),
        "w2": s * jax.random.normal(ks[2], (channels, cr), jnp.float32),
        "b2": s * jax.random.normal(ks[3], (channels, 1), jnp.float32),
    }


# Pure-JAX reference (verification only).
def ca_reference(x_nchw, p):
    x = x_nchw.astype(jnp.float32)
    pooled = jnp.mean(x, axis=(2, 3))                                 # (N, C)
    y = jnp.maximum(pooled @ p["w1"].T + p["b1"][:, 0], 0.0)          # (N, Cr)
    y = jax.nn.sigmoid(y @ p["w2"].T + p["b2"][:, 0])                 # (N, C)
    return (x * y[:, :, None, None]).astype(x_nchw.dtype)


if __name__ == "__main__":
    # CALayer defaults: channel=64, reduction=16 (C must be divisible by reduction).
    N, C, H, W = 2, 64, 16, 16
    reduction = 16

    key = jax.random.PRNGKey(0)
    kx, kp = jax.random.split(key)
    x = jax.random.normal(kx, (N, C, H, W), jnp.float32)
    params = init_params(kp, C, reduction)

    out = jax.block_until_ready(ca_layer(x, params))
    ref = jax.block_until_ready(ca_reference(x, params))

    assert out.shape == (N, C, H, W)
    err = float(jnp.max(jnp.abs(out - ref)))
    assert jnp.allclose(out, ref, atol=1e-4, rtol=1e-4), err
    print("KERNEL_OK")
</pallas_src>

<mosaic_0001>
module attributes {stable_mosaic.version = 11 : i64} {
  func.func @_ca_kernel(%arg0: i32, %arg1: memref<1x64x256xf32, #tpu.memory_space<vmem>>, %arg2: memref<4x64xf32, #tpu.memory_space<vmem>>, %arg3: memref<4x1xf32, #tpu.memory_space<vmem>>, %arg4: memref<64x4xf32, #tpu.memory_space<vmem>>, %arg5: memref<64x1xf32, #tpu.memory_space<vmem>>, %arg6: memref<1x64x256xf32, #tpu.memory_space<vmem>>) attributes {dimension_semantics = [#tpu.dimension_semantics<parallel>], iteration_bounds = array<i64: 2>, scalar_prefetch = 0 : i64, scratch_operands = 0 : i64, tpu.core_type = #tpu.core_type<tc>, window_params = [{transform_indices = @transform_0, window_bounds = array<i64: 1, 64, 256>}, {pipeline_mode = #tpu.pipeline_mode<synchronous>, transform_indices = @transform_1, window_bounds = array<i64: 4, 64>}, {pipeline_mode = #tpu.pipeline_mode<synchronous>, transform_indices = @transform_2, window_bounds = array<i64: 4, 1>}, {pipeline_mode = #tpu.pipeline_mode<synchronous>, transform_indices = @transform_3, window_bounds = array<i64: 64, 4>}, {pipeline_mode = #tpu.pipeline_mode<synchronous>, transform_indices = @transform_4, window_bounds = array<i64: 64, 1>}, {transform_indices = @transform_5, window_bounds = array<i64: 1, 64, 256>}]} {
    %c0 = arith.constant 0 : index
    %c0_0 = arith.constant 0 : index
    %0 = vector.load %arg2[%c0, %c0_0] : memref<4x64xf32, #tpu.memory_space<vmem>>, vector<4x64xf32>
    %c0_1 = arith.constant 0 : index
    %c0_2 = arith.constant 0 : index
    %1 = vector.load %arg3[%c0_1, %c0_2] : memref<4x1xf32, #tpu.memory_space<vmem>>, vector<4x1xf32>
    %c0_3 = arith.constant 0 : index
    %c0_4 = arith.constant 0 : index
    %2 = vector.load %arg4[%c0_3, %c0_4] : memref<64x4xf32, #tpu.memory_space<vmem>>, vector<64x4xf32>
    %c0_5 = arith.constant 0 : index
    %c0_6 = arith.constant 0 : index
    %3 = vector.load %arg5[%c0_5, %c0_6] : memref<64x1xf32, #tpu.memory_space<vmem>>, vector<64x1xf32>
    %c0_7 = arith.constant 0 : index
    %c0_8 = arith.constant 0 : index
    %c0_9 = arith.constant 0 : index
    %4 = vector.load %arg1[%c0_7, %c0_8, %c0_9] : memref<1x64x256xf32, #tpu.memory_space<vmem>>, vector<1x64x256xf32>
    %5 = vector.shape_cast %4 : vector<1x64x256xf32> to vector<64x256xf32>
    %cst = arith.constant dense<0.000000e+00> : vector<4x256xf32>
    %6 = tpu.matmul %0, %5, %cst {dimension_numbers = #tpu.dot_dimension_numbers<[1], [0], [0], [1], [0, 0, 1, 1], [], []>} : vector<4x64xf32>, vector<64x256xf32>, vector<4x256xf32> -> vector<4x256xf32>
    %cst_10 = arith.constant dense<0.000000e+00> : vector<4xf32>
    %7 = vector.multi_reduction <add>, %6, %cst_10 [1] : vector<4x256xf32> to vector<4xf32>
    %8 = vector.shape_cast %7 : vector<4xf32> to vector<4x1xf32>
    %cst_11 = arith.constant 3.906250e-03 : f32
    %9 = vector.broadcast %cst_11 : f32 to vector<4x1xf32>
    %10 = arith.mulf %8, %9 : vector<4x1xf32>
    %11 = arith.addf %10, %1 : vector<4x1xf32>
    %cst_12 = arith.constant 0.000000e+00 : f32
    %12 = vector.broadcast %cst_12 : f32 to vector<4x1xf32>
    %13 = arith.maximumf %11, %12 : vector<4x1xf32>
    %cst_13 = arith.constant dense<0.000000e+00> : vector<64x1xf32>
    %14 = tpu.matmul %2, %13, %cst_13 {dimension_numbers = #tpu.dot_dimension_numbers<[1], [0], [0], [1], [0, 0, 1, 1], [], []>} : vector<64x4xf32>, vector<4x1xf32>, vector<64x1xf32> -> vector<64x1xf32>
    %15 = arith.addf %14, %3 : vector<64x1xf32>
    %16 = arith.negf %15 : vector<64x1xf32>
    %17 = math.exp %16 : vector<64x1xf32>
    %cst_14 = arith.constant 1.000000e+00 : f32
    %18 = vector.broadcast %cst_14 : f32 to vector<64x1xf32>
    %19 = arith.addf %18, %17 : vector<64x1xf32>
    %20 = arith.divf %18, %19 : vector<64x1xf32>
    %21 = vector.broadcast %20 : vector<64x1xf32> to vector<64x256xf32>
    %22 = arith.mulf %5, %21 : vector<64x256xf32>
    %c0_15 = arith.constant 0 : index
    %c0_16 = arith.constant 0 : index
    %c0_17 = arith.constant 0 : index
    %23 = vector.load %arg6[%c0_15, %c0_16, %c0_17] : memref<1x64x256xf32, #tpu.memory_space<vmem>>, vector<1x64x256xf32>
    %24 = vector.shape_cast %23 : vector<1x64x256xf32> to vector<64x256xf32>
    %25 = vector.shape_cast %22 : vector<64x256xf32> to vector<1x64x256xf32>
    tpu.vector_store %arg6[%c0_15, %c0_16, %c0_17], %25 {strides = array<i32>} : memref<1x64x256xf32, #tpu.memory_space<vmem>>, vector<1x64x256xf32>,
    return
  }
  func.func @transform_0(%arg0: i32) -> (i32, i32, i32) {
    %c0_i32 = arith.constant 0 : i32
    %c0_i32_0 = arith.constant 0 : i32
    %c0_i32_1 = arith.constant 0 : i32
    return %arg0, %c0_i32, %c0_i32_0 : i32, i32, i32
  }
  func.func @transform_1(%arg0: i32) -> (i32, i32) {
    %c0_i32 = arith.constant 0 : i32
    %c0_i32_0 = arith.constant 0 : i32
    %c0_i32_1 = arith.constant 0 : i32
    return %c0_i32, %c0_i32_0 : i32, i32
  }
  func.func @transform_2(%arg0: i32) -> (i32, i32) {
    %c0_i32 = arith.constant 0 : i32
    %c0_i32_0 = arith.constant 0 : i32
    %c0_i32_1 = arith.constant 0 : i32
    return %c0_i32, %c0_i32_0 : i32, i32
  }
  func.func @transform_3(%arg0: i32) -> (i32, i32) {
    %c0_i32 = arith.constant 0 : i32
    %c0_i32_0 = arith.constant 0 : i32
    %c0_i32_1 = arith.constant 0 : i32
    return %c0_i32, %c0_i32_0 : i32, i32
  }
  func.func @transform_4(%arg0: i32) -> (i32, i32) {
    %c0_i32 = arith.constant 0 : i32
    %c0_i32_0 = arith.constant 0 : i32
    %c0_i32_1 = arith.constant 0 : i32
    return %c0_i32, %c0_i32_0 : i32, i32
  }
  func.func @transform_5(%arg0: i32) -> (i32, i32, i32) {
    %c0_i32 = arith.constant 0 : i32
    %c0_i32_0 = arith.constant 0 : i32
    %c0_i32_1 = arith.constant 0 : i32
    return %arg0, %c0_i32, %c0_i32_0 : i32, i32, i32
  }
}

</mosaic_0001>

<bundles_post_ra>
// kernel: tpu_custom_call.1
= control target key start
LH: loop header
LB: loop body
LE: loop exit
PB: predicated region body
PF: predicated region fallthrough
CT: control target
= control target key end

     0   :  { %10 = vsyncpa [#allocation3], 0  ;;  %s1329_s0 = inlined_call_operand.hbm [shape: f32[2,64,256], index: 0, kind: input, shape index: {}]   ;;  %s1330_s1 = inlined_call_operand.vmem [shape: f32[4,64], index: 1, kind: input, shape index: {}]   ;;  %s1331_s2 = inlined_call_operand.vmem [shape: f32[4,1], index: 2, kind: input, shape index: {}]   ;;  %s1332_s3 = inlined_call_operand.vmem [shape: f32[64,4], index: 3, kind: input, shape index: {}]   ;;  %s1333_s4 = inlined_call_operand.vmem [shape: f32[64,1], index: 4, kind: input, shape index: {}]   ;;  %s1334_s5 = inlined_call_operand.hbm [shape: f32[2,64,256], index: 5, kind: output, shape index: {}]  }
   0x1   :  { %12 = vsyncpa [#allocation3 + $0x1], 0 }
   0x2   :  { %13 = vsyncpa [#allocation4], 0 }
   0x3   :  { %15 = vsyncpa [#allocation4 + $0x1], 0  ;;  %s996_s18 = smov 0   ;;  %s998_s19 = smov 0  }
   0x4   :  { %s1000_s20 = smov 0   ;;  %s1002_s21 = smov 0  }
   0x5 LB: > { %s1017_s22 = sadd.s32 4294967295, %s956_s21   ;;  %s701_s23 = sadd.s32 4294967294, %s956_s21   ;;  %s956_s21 = sphi %s1002_s21, %s1347_s21   ;;  %s952_s20 = sphi %s1000_s20, %s1346_s20   ;;  %s948_s19 = sphi %s998_s19, %s1345_s19   ;;  %s944_s18 = sphi %s996_s18, %s1344_s18  }
   0x6   : > { %s1021_s24 = sadd.s32 1, %s956_s21   ;;  %s28_s25 = sadd.s32 1, %s952_s20 }
   0x7   : > { %s25_s26 = ssub.s32 %s956_s21, %s1021_s24  ;;  %p35_p0 = scmp.ne.s32.totalorder %s952_s20, %s948_s19 }
   0x8   : > { %p26_p1 = scmp.eq.s32.totalorder %s25_s26, 0  ;;  %p36_p2 = scmp.eq.s32.totalorder %s956_s21, 0 }
   0x9   : > { %p41_p3 = scmp.ne.s32.totalorder %s948_s19, %s944_s18  ;;  %p42_p4 = scmp.eq.s32.totalorder %s1017_s22, 0 }
   0xa   : > { %s1033_s27 = scalar_select %p26_p1, %s952_s20, %s28_s25  }
   0xb   : > { %p1035_p5 = por %p36_p2, %p35_p0  ;;  %p1039_p6 = por %p42_p4, %p41_p3 }
   0xc   : > { %p149_p7 = scmp.eq.s32.totalorder %s1017_s22, 1  ;;  %p155_p8 = scmp.eq.s32.totalorder %s701_s23, 1 }
   0xd   : > { %p786_p10 = scmp.lt.s32.totalorder %s956_s21, 2  ;;  %s187_s7 = sand.u32 1, %s952_s20  }
   0xe   : > { %p1046_p11 = por %p149_p7, %p35_p0  ;;  %p1050_p12 = por %p155_p8, %p41_p3 }
   0xf   : > { %s733_s8 = sshll.u32 %s956_s21, 11  ;;  %s704_s9 = sshll.u32 %s187_s7, 7 }
  0x10   : > { %s1338_s30 = scalar_select %p1046_p11, 1, 0 }
  0x11   : > { %s1339_s6 = scalar_select %p1050_p12, 1, 0 }
  0x12   : > { %s1059_s12 = scalar_lea.hbm %s1329_s0, %s733_s8  ;;  %s191_s13 = scalar_lea.vmem [#allocation2], %s704_s9 }
  0x13   : > { %s198_s14 = sshll.u32 %s191_s13, 4  ;;  %p1063_p13 = pnand %p786_p10, %p1035_p5  ;;  %s1067_s14 = int_to_ptr.vmem [resolvable:$true] %s198_s14 }
  0x14   : > { %s1069_s16 = scalar_lea.sflag [#allocation3], %s187_s7  ;;  %s860_s17 = scalar_lea.hbm %s1059_s12, 2048 }
  0x15   : > { %p861_p0 = scmp.ne.s32.totalorder %s1059_s12, %s860_s17  ;;  %p862_p1 = pneg %p1063_p13 }
  0x16   : > { %s865_s26 = scalar_lea.hbm %s1329_s0, 4096  ;;  %p866_p4 = scmp.lt.u32.totalorder %s1059_s12, %s1329_s0 }
  0x17   : > { %p863_p2 = pnand %p862_p1, %p861_p0  ;;  %p867_p5 = scmp.lt.u32.totalorder %s865_s26, %s860_s17 }
  0x18   : > { %p869_p8 = scmp.lt.u32.totalorder %s860_s17, %s1059_s12 }
  0x19   : > { %p864_p3 = pneg %p863_p2  ;;  %p868_p7 = por %p867_p5, %p866_p4 }
  0x1b   : > { %p870_p10 = por %p869_p8, %p868_p7 }
  0x1d   : > { %p871_p9 = pnand %p870_p10, %p864_p3 }
  0x1f   : > { %874 = shalt.err (!%p871_p9)
}
  0x20   : > { %s875_s7 = scalar_lea.vmem %s1067_s14, 2048  ;;  %s958_s9 = smov [#allocation2]  }
  0x21   : > { %p876_p0 = scmp.ne.s32.totalorder %s1067_s14, %s875_s7  ;;  %s880_s10 = sshll.u32 %s958_s9, 4  ;;  %s881_s10 = int_to_ptr.vmem [resolvable:$false] %s880_s10 }
  0x22   : > { %s882_s11 = scalar_lea.vmem %s881_s10, 4096  ;;  %p883_p11 = scmp.lt.s32.totalorder %s1067_s14, %s881_s10 }
  0x23   : > { %p878_p2 = pnand %p876_p0, %p862_p1  ;;  %p884_p4 = scmp.lt.s32.totalorder %s882_s11, %s875_s7 }
  0x25   : > { %p879_p12 = pneg %p878_p2  ;;  %p885_p5 = por %p884_p4, %p883_p11 }
  0x27   : > { %p886_p7 = pnand %p885_p5, %p879_p12 }
  0x29   : > { %889 = shalt.err (!%p886_p7)
}
  0x2a   : > { %s959_s13 = smov 256   ;;  %s960_s17 = smov 16  }
  0x2b   : > { %781 = dma.hbm_to_vmem [thread:$0]  (!%p1063_p13), %s1059_s12, 2048, %s1067_s14, %s1069_s16, %s959_s13, %s959_s13, %s960_s17  }
  0x2c   : > { %p707_p9 = scmp.ge.s32.totalorder %s956_s21, 1  ;;  %p206_p1 = scmp.lt.s32.totalorder %s956_s21, 3 }
  0x2e   : > { %p207_p3 = pnand %p707_p9, %p206_p1 }
  0x2f   : > { %s1100_s23 = sand.u32 (!%p207_p3), 1, %s948_s19  }
  0x30   : > { %210 = sbr.rel (%p207_p3) target bundleno = 850 (0x352), region = 40  ;;  %s708_s25 = sshll.u32 (!%p207_p3), %s1100_s23, 7 }
  0x31   : > { %s213_s26 = scalar_lea.sflag (!%p207_p3), [#allocation3], %s1100_s23  ;;  %s1106_s28 = scalar_lea.vmem (!%p207_p3), [#allocation2], %s708_s25 }
  0x37   : > { %935 = dma.done.wait (%p1039_p6), %s213_s26, 2048  }
  0x38   : > { %937 = vsyncadd (%p1039_p6), %s213_s26, 4294965248  ;;  %v961_v0 = vmov 0.0   ;;  %v1113_v1 = vld [vmem:[%s1106_s28 + $0x8] sm:$0xff]  ;;  %v1116_v2 = vld [vmem:[%s1106_s28 + $0x18] sm:$0xff]  ;;  %vm277_vm0 = vcmask 523264   ;;  %vm352_vm1 = vcmask 1043456  }
  0x39   : > { %345 = vmatprep.mubr.f32.mxu0 %v961_v0  ;;  %v1119_v3 = vld [vmem:[%s1106_s28] sm:$0xff]  ;;  %v758_v4 = vpack.c.bf16 %v1116_v2, %v1113_v1  ;;  %v1124_v5 = vld [vmem:[%s1106_s28 + $0x10] sm:$0xff]  ;;  %v1127_v6 = vld [vmem:[%s1106_s28 + $0x28] sm:$0xff]  ;;  %vm361_vm2 = vcmask 31744   ;;  %v962_v44 = vmov 0   ;;  %s1248_s10 = scalar_lea.vmem [#allocation5], %s708_s25 }
  0x3a   : > { %v1130_v7 = vld [vmem:[%s1106_s28 + $0x38] sm:$0xff]  ;;  %v760_v8 = vpack.c.bf16 %v1124_v5, %v1119_v3  ;;  %v1137_v10 = vld [vmem:[%s1106_s28 + $0x20] sm:$0xff]  ;;  %v1140_v11 = vld [vmem:[%s1106_s28 + $0x30] sm:$0xff]  ;;  %827 = vset.pattern.permute.xlu1 %v962_v44  ;;  %826 = vset.pattern.permute.xlu0 %v962_v44  ;;  %s734_s25 = sshll.u32 %s1017_s22, 11  ;;  %s628_s11 = sshll.u32 %s1248_s10, 4  ;;  %s1281_s11 = int_to_ptr.vmem [resolvable:$true] %s628_s11 }
  0x3b   : > { %v762_v9 = vpack.c.bf16 %v1130_v7, %v1127_v6  ;;  %v1143_v12 = vld [vmem:[%s1106_s28 + $0x48] sm:$0xff]  ;;  %759 = vmatprep.subr.bf16.mxu0 %v758_v4  ;;  %v1146_v13 = vld [vmem:[%s1106_s28 + $0x58] sm:$0xff]  ;;  %v764_v14 = vpack.c.bf16 %v1140_v11, %v1137_v10  ;;  %v1153_v16 = vld [vmem:[%s1106_s28 + $0x40] sm:$0xff]  ;;  %s1279_s26 = scalar_lea.hbm %s1334_s5, %s734_s25  ;;  %s615_s22 = scalar_lea.sflag [#allocation4], %s1100_s23 }
  0x3c   : > { %761 = vmatpush1.bf16.msra.mxu0 %v760_v8  ;;  %v766_v15 = vpack.c.bf16 %v1146_v13, %v1143_v12  ;;  %v1156_v17 = vld [vmem:[%s1106_s28 + $0x50] sm:$0xff]  ;;  %v1159_v18 = vld [vmem:[%s1106_s28 + $0x68] sm:$0xff]  ;;  %v1162_v19 = vld [vmem:[%s1106_s28 + $0x78] sm:$0xff]  ;;  %p1341_p11 = scmp.ne.s32.totalorder %s1338_s30, 0  ;;  %s963_s29 = smov [#allocation5]  }
  0x3d   : > { %763 = vmatprep.subr.bf16.mxu0 %v762_v9  ;;  %v768_v20 = vpack.c.bf16 %v1156_v17, %v1153_v16  ;;  %v770_v21 = vpack.c.bf16 %v1162_v19, %v1159_v18  ;;  %v1169_v22 = vld [vmem:[%s1106_s28 + $0x60] sm:$0xff]  ;;  %v1172_v23 = vld [vmem:[%s1106_s28 + $0x70] sm:$0xff]  ;;  %v246_v37 = vld [vmem:[%s1332_s3 + $0x8] sm:$0xff]  ;;  %s890_s28 = scalar_lea.vmem %s1281_s11, 2048  ;;  %s894_s12 = sshll.u32 %s963_s29, 4  ;;  %s895_s12 = int_to_ptr.vmem [resolvable:$false] %s894_s12 }
  0x3e   : > { %v772_v24 = vpack.c.bf16 %v1172_v23, %v1169_v22  ;;  %v243_v25 = vld [vmem:[%s1330_s1] sm:$0xf]  ;;  %v247_v38 = vld [vmem:[%s1332_s3 + $0x10] sm:$0xff]  ;;  %v248_v39 = vld [vmem:[%s1332_s3 + $0x18] sm:$0xff]  ;;  %p891_p6 = scmp.ne.s32.totalorder %s1281_s11, %s890_s28  ;;  %s896_s14 = scalar_lea.vmem %s895_s12, 4096 }
  0x3f   : > { %v245_v31 = vld [vmem:[%s1332_s3] sm:$0xff]  ;;  %v250_v41 = vld [vmem:[%s1332_s3 + $0x28] sm:$0xff]  ;;  %v251_v42 = vld [vmem:[%s1332_s3 + $0x30] sm:$0xff]  ;;  %p897_p8 = scmp.lt.s32.totalorder %s1281_s11, %s895_s12  ;;  %p898_p10 = scmp.lt.s32.totalorder %s896_s14, %s890_s28 }
  0x40   : > { %765 = vmatpush1.bf16.msra.mxu0 %v764_v14  ;;  %746 = vmatprep.mubr.msk.f32.mxu1 %vm361_vm2, %v245_v31  ;;  %v244_v33 = vld [vmem:[%s1331_s2] sm:$0xf]  ;;  %v252_v43 = vld [vmem:[%s1332_s3 + $0x38] sm:$0xff]  ;;  %v254_v45 = vld [vmem:[%s1333_s4 + $0x8] sm:$0xff]  ;;  %p892_p12 = pnand %p891_p6, %p1341_p11 }
  0x41   : > { %767 = vmatprep.subr.bf16.mxu0 %v766_v15  ;;  %v249_v40 = vld [vmem:[%s1332_s3 + $0x20] sm:$0xff]  ;;  %v256_v51 = vld [vmem:[%s1333_s4 + $0x18] sm:$0xff]  ;;  %v255_v53 = vld [vmem:[%s1333_s4 + $0x10] sm:$0xff]  ;;  %p899_p0 = por %p898_p10, %p897_p8 }
  0x42   : > { %v253_v46 = vld [vmem:[%s1333_s4] sm:$0xff]  ;;  %v258_v59 = vld [vmem:[%s1333_s4 + $0x28] sm:$0xff]  ;;  %v259_v14 = vld [vmem:[%s1333_s4 + $0x30] sm:$0xff]  ;;  %p893_p13 = pneg %p892_p12 }
  0x43   : > { %v257_v61 = vld [vmem:[%s1333_s4 + $0x20] sm:$0xff] }
  0x44   : > { %769 = vmatpush1.bf16.msra.mxu0 %v768_v20  ;;  %p900_p2 = pnand %p899_p0, %p893_p13 }
  0x45   : > { %771 = vmatprep.subr.bf16.mxu0 %v770_v21 }
  0x48   : > { %773 = vmatpush1.bf16.msra.mxu0 %v772_v24  ;;  %v260_v24 = vld [vmem:[%s1333_s4 + $0x38] sm:$0xff] }
  0x4b   : > { %710 = vmatmul.mubr.msk.f32.vlgmr.msra.gmra.mrb[0].mxu0 %vm277_vm0, %v243_v25 }
 0x11e   : > { %v347_v26 = vpop.f32.mrb[0].mxu0 }
 0x11f   : > { %v353_v27 = vsel %vm352_vm1, %v347_v26, 0.0  ;;  %v349_v28 = vpop.f32.mrb[1].mxu0 }
 0x120   : > { %v354_v29 = vsel %vm352_vm1, %v349_v28, 0.0 }
 0x121   : > { %v355_v30 = vadd.f32 %v354_v29, %v353_v27 }
 0x123   : > { %356 = vadd.xlane.f32.xlu0 %v355_v30 }
 0x1b0   : > { %v357_v32 = vpop.xlane.xlu0 %356 }
 0x1b1   : > { %v358_v34 = vmul.f32 0.00390625, %v357_v32 }
 0x1b3   : > { %v359_v35 = vadd.f32 %v358_v34, %v244_v33 }
 0x1b5   : > { %v360_v36 = vmax.f32 %v359_v35, 0.0 }
 0x1b7   : > { %744 = vmatprep.subr.msk.mxu1 %vm352_vm1, %v360_v36 }
 0x1b8   : > { %745 = vmatpush3.msk.msra.mxu1 %vm352_vm1, %v360_v36 }
 0x1b9   : > { %747 = vmatmul.mubr.msk.f32.vlgmr.msra.gmra.mrb[0].mxu1 %vm361_vm2, %v246_v37 }
 0x1ba   : > { %749 = vmatprep.mubr.msk.f32.mxu1 %vm361_vm2, %v247_v38 }
 0x1bd   : > { %750 = vmatmul.mubr.msk.f32.gmra.mrb[2].mxu1 %vm361_vm2, %v248_v39 }
 0x1be   : > { %752 = vmatprep.mubr.msk.f32.mxu1 %vm361_vm2, %v249_v40 }
 0x1c1   : > { %753 = vmatmul.mubr.msk.f32.gmra.mrb[4].mxu1 %vm361_vm2, %v250_v41 }
 0x1c2   : > { %755 = vmatprep.mubr.msk.f32.mxu1 %vm361_vm2, %v251_v42 }
 0x1c5   : > { %756 = vmatmul.mubr.msk.f32.gmra.mrb[6].mxu1 %vm361_vm2, %v252_v43 }
 0x28c   : > { %v748_v47 = vpop.f32.mrb[0].mxu1 }
 0x28d   : > { %v461_v48 = vadd.f32 %v748_v47, %v254_v45  ;;  %v455_v49 = vpop.f32.mrb[1].mxu1 }
 0x28e   : > { %v456_v50 = vadd.f32 %v455_v49, %v253_v46 }
 0x28f   : > { %v721_v52 = vmul.f32 -1.442695, %v461_v48 }
 0x290   : > { %v720_v54 = vmul.f32 -1.442695, %v456_v50  ;;  %v751_v55 = vpop.f32.mrb[2].mxu1 }
 0x291   : > { %828 = vpow2.f32 %v721_v52  ;;  %v471_v56 = vadd.f32 %v751_v55, %v256_v51  ;;  %v465_v57 = vpop.f32.mrb[3].mxu1 }
 0x292   : > { %830 = vpow2.f32 %v720_v54  ;;  %v466_v58 = vadd.f32 %v465_v57, %v255_v53 }
 0x293   : > { %v723_v60 = vmul.f32 -1.442695, %v471_v56 }
 0x294   : > { %v722_v62 = vmul.f32 -1.442695, %v466_v58  ;;  %v754_v63 = vpop.f32.mrb[4].mxu1 }
 0x295   : > { %832 = vpow2.f32 %v723_v60  ;;  %v481_v0 = vadd.f32 %v754_v63, %v258_v59  ;;  %v475_v4 = vpop.f32.mrb[5].mxu1 }
 0x296   : > { %834 = vpow2.f32 %v722_v62  ;;  %v476_v8 = vadd.f32 %v475_v4, %v257_v61 }
 0x297   : > { %v725_v9 = vmul.f32 -1.442695, %v481_v0 }
 0x298   : > { %v757_v15 = vpop.f32.mrb[6].mxu1  ;;  %v724_v20 = vmul.f32 -1.442695, %v476_v8 }
 0x299   : > { %836 = vpow2.f32 %v725_v9  ;;  %v485_v21 = vpop.f32.mrb[7].mxu1  ;;  %v491_v31 = vadd.f32 %v757_v15, %v260_v24 }
 0x29a   : > { %v486_v25 = vadd.f32 %v485_v21, %v259_v14  ;;  %838 = vpow2.f32 %v724_v20 }
 0x29b   : > { %v829_v26 = vpop.eup %828  ;;  %v727_v35 = vmul.f32 -1.442695, %v491_v31 }
 0x29c   : > { %v831_v27 = vpop.eup %830  ;;  %v519_v28 = vadd.f32 1.0, %v829_v26  ;;  %v726_v29 = vmul.f32 -1.442695, %v486_v25 }
 0x29d   : > { %v518_v30 = vadd.f32 1.0, %v831_v27 }
 0x29e   : > { %840 = vrcp.f32 %v519_v28 }
 0x29f   : > { %v833_v32 = vpop.eup %832  ;;  %842 = vrcp.f32 %v518_v30 }
 0x2a0   : > { %v835_v33 = vpop.eup %834  ;;  %v521_v34 = vadd.f32 1.0, %v833_v32  ;;  %844 = vpow2.f32 %v726_v29 }
 0x2a1   : > { %v520_v36 = vadd.f32 1.0, %v835_v33 }
 0x2a2   : > { %846 = vrcp.f32 %v521_v34 }
 0x2a3   : > { %v837_v37 = vpop.eup %836  ;;  %848 = vpow2.f32 %v727_v35 }
 0x2a4   : > { %v523_v38 = vadd.f32 1.0, %v837_v37  ;;  %850 = vrcp.f32 %v520_v36  ;;  %v839_v39 = vpop.eup %838 }
 0x2a5   : > { %v522_v43 = vadd.f32 1.0, %v839_v39 }
 0x2a6   : > { %852 = vrcp.f32 %v523_v38 }
 0x2a7   : > { %854 = vrcp.f32 %v522_v43 }
 0x2a8   : > { %v841_v40 = vpop.eup %840 }
 0x2a9   : > { %v843_v41 = vpop.eup %842  ;;  %549 = vperm.xlu1 %827, %v841_v40  }
 0x2aa   : > { %v845_v42 = vpop.eup %844  ;;  %544 = vperm.xlu0 %826, %v843_v41  }
 0x2ab   : > { %v524_v45 = vadd.f32 1.0, %v845_v42 }
 0x2ac   : > { %v847_v44 = vpop.eup %846 }
 0x2ad   : > { %559 = vperm.xlu1 %827, %v847_v44   ;;  %v849_v46 = vpop.eup %848  ;;  %856 = vrcp.f32 %v524_v45 }
 0x2ae   : > { %v851_v47 = vpop.eup %850  ;;  %v525_v49 = vadd.f32 1.0, %v849_v46 }
 0x2b0   : > { %v853_v48 = vpop.eup %852  ;;  %858 = vrcp.f32 %v525_v49 }
 0x2b1   : > { %554 = vperm.xlu1 %827, %v851_v47   ;;  %v855_v50 = vpop.eup %854 }
 0x2b5   : > { %569 = vperm.xlu1 %827, %v853_v48  }
 0x2b7   : > { %v857_v51 = vpop.eup %856 }
 0x2b9   : > { %564 = vperm.xlu1 %827, %v855_v50  }
 0x2ba   : > { %v859_v52 = vpop.eup %858 }
 0x2bd   : > { %574 = vperm.xlu1 %827, %v857_v51  }
 0x2c1   : > { %579 = vperm.xlu1 %827, %v859_v52  }
 0x328   : > { %v550_v53 = vpop.permute.xlu1 %549 }
 0x329   : > { %v584_v54 = vmul.f32 %v550_v53, %v1124_v5  ;;  %v585_v55 = vmul.f32 %v550_v53, %v1116_v2  ;;  %v545_v56 = vpop.permute.xlu0 %544 }
 0x32a   : > { %v582_v57 = vmul.f32 %v545_v56, %v1119_v3  ;;  %v583_v58 = vmul.f32 %v545_v56, %v1113_v1 }
 0x32b   : > { %600 = vst [vmem:[%s1248_s10 + $0x10] sm:$0xff] %v584_v54  ;;  %601 = vst [vmem:[%s1248_s10 + $0x18] sm:$0xff] %v585_v55 }
 0x32c   : > { %598 = vst [vmem:[%s1248_s10] sm:$0xff] %v582_v57  ;;  %599 = vst [vmem:[%s1248_s10 + $0x8] sm:$0xff] %v583_v58  ;;  %v560_v2 = vpop.permute.xlu1 %559 }
 0x32d   : > { %v588_v1 = vmul.f32 %v560_v2, %v1140_v11  ;;  %v589_v3 = vmul.f32 %v560_v2, %v1130_v7 }
 0x32f   : > { %604 = vst [vmem:[%s1248_s10 + $0x30] sm:$0xff] %v588_v1  ;;  %605 = vst [vmem:[%s1248_s10 + $0x38] sm:$0xff] %v589_v3 }
 0x330   : > { %v555_v5 = vpop.permute.xlu1 %554 }
 0x331   : > { %v586_v59 = vmul.f32 %v555_v5, %v1137_v10  ;;  %v587_v60 = vmul.f32 %v555_v5, %v1127_v6 }
 0x333   : > { %602 = vst [vmem:[%s1248_s10 + $0x20] sm:$0xff] %v586_v59  ;;  %603 = vst [vmem:[%s1248_s10 + $0x28] sm:$0xff] %v587_v60 }
 0x334   : > { %v570_v61 = vpop.permute.xlu1 %569 }
 0x335   : > { %v592_v11 = vmul.f32 %v570_v61, %v1156_v17  ;;  %v593_v7 = vmul.f32 %v570_v61, %v1146_v13 }
 0x337   : > { %608 = vst [vmem:[%s1248_s10 + $0x50] sm:$0xff] %v592_v11  ;;  %609 = vst [vmem:[%s1248_s10 + $0x58] sm:$0xff] %v593_v7 }
 0x338   : > { %v565_v62 = vpop.permute.xlu1 %564 }
 0x339   : > { %v590_v63 = vmul.f32 %v565_v62, %v1153_v16  ;;  %v591_v10 = vmul.f32 %v565_v62, %v1143_v12 }
 0x33b   : > { %606 = vst [vmem:[%s1248_s10 + $0x40] sm:$0xff] %v590_v63  ;;  %607 = vst [vmem:[%s1248_s10 + $0x48] sm:$0xff] %v591_v10 }
 0x33c   : > { %v575_v6 = vpop.permute.xlu1 %574 }
 0x33d   : > { %v594_v0 = vmul.f32 %v575_v6, %v1169_v22  ;;  %v595_v17 = vmul.f32 %v575_v6, %v1159_v18 }
 0x33f   : > { %610 = vst [vmem:[%s1248_s10 + $0x60] sm:$0xff] %v594_v0  ;;  %611 = vst [vmem:[%s1248_s10 + $0x68] sm:$0xff] %v595_v17 }
 0x340   : > { %v580_v13 = vpop.permute.xlu1 %579 }
 0x341   : > { %v596_v12 = vmul.f32 %v580_v13, %v1172_v23  ;;  %v597_v16 = vmul.f32 %v580_v13, %v1162_v19 }
 0x343   : > { %612 = vst [vmem:[%s1248_s10 + $0x70] sm:$0xff] %v596_v12  ;;  %613 = vst [vmem:[%s1248_s10 + $0x78] sm:$0xff] %v597_v16 }
 0x344   : > { %903 = shalt.err (!%p900_p2)
}
 0x345   : > { %s904_s15 = scalar_lea.hbm %s1279_s26, 2048  ;;  %s908_s7 = scalar_lea.hbm %s1334_s5, 4096 }
 0x346   : > { %p905_p4 = scmp.ne.s32.totalorder %s1279_s26, %s904_s15  ;;  %p909_p9 = scmp.lt.u32.totalorder %s1279_s26, %s1334_s5 }
 0x347   : > { %p910_p1 = scmp.lt.u32.totalorder %s908_s7, %s904_s15  ;;  %p912_p6 = scmp.lt.u32.totalorder %s904_s15, %s1279_s26 }
 0x348   : > { %p906_p5 = pnand %p905_p4, %p1341_p11 }
 0x349   : > { %p911_p3 = por %p910_p1, %p909_p9 }
 0x34a   : > { %p907_p7 = pneg %p906_p5 }
 0x34b   : > { %p913_p12 = por %p912_p6, %p911_p3 }
 0x34d   : > { %p914_p13 = pnand %p913_p12, %p907_p7 }
 0x34f   : > { %917 = shalt.err (!%p914_p13)
}
 0x350   : > { %s964_s25 = smov 256   ;;  %s965_s13 = smov 16  }
 0x351   : > { %776 = dma.vmem_to_hbm [thread:$0]  (%p1341_p11), %s1281_s11, 2048, %s1279_s26, %s615_s22, %s964_s25, %s964_s25, %s965_s13  }
 0x352 PF: > { %s643_s17 = sand.u32 1, %s944_s18   ;;  %p1342_p8 = scmp.ne.s32.totalorder %s1339_s6, 0 }
 0x353   : > { %p1343_p10 = scmp.ge.s32.totalorder %s956_s21, 2  ;;  %s644_s28 = scalar_lea.sflag [#allocation4], %s643_s17 }
 0x355   : > { %p783_p0 = pnand %p1343_p10, %p1342_p8 }
 0x357   : > { %939 = dma.done.wait (!%p783_p0), %s644_s28, 2048  }
 0x358   : > { %941 = vsyncadd (!%p783_p0), %s644_s28, 4294965248  ;;  %p18_p2 = scmp.ge.s32.totalorder %s1021_s24, 4   ;;  %s1344_s18 = smov %s948_s19 }
 0x359   : > { %s1345_s19 = smov %s952_s20  ;;  %s1346_s20 = smov %s1033_s27 }
 0x35a   : > { %s1347_s21 = smov %s1021_s24  ;;  %20 = sbr.rel (!%p18_p2) target bundleno = 5 (0x5), region = 85 }
 0x361   :  { %649 = vsyncpa [#allocation3], 1 }
 0x362   :  { %651 = vsyncpa [#allocation3 + $0x1], 1 }
 0x363   :  { %652 = vsyncpa [#allocation4], 1 }
 0x364   :  { %654 = vsyncpa [#allocation4 + $0x1], 1 }

</bundles_post_ra>
